<compile_context>
chip_gen: v6e
topology: v6e:2x2x1
jax: 0.10.0
libtpu: 0.0.40
codegen_flags: <defaults>
</compile_context>

<pallas_src>
import functools
import sys

import jax
import jax.numpy as jnp
from jax import lax
from jax.experimental import pallas as pl
from jax.experimental.pallas import tpu as pltpu


_LANES = 128
_SUBLANES = 8
_NUM_CORES = 2   # leading "parallel" grid axis; splits work across the 2 TCs
                 # on v7x, serialized (and still correct) on 1-TC v5e/v6e.


def _cdiv(a, b):
    return (a + b - 1) // b


def _sublane_multiple(itemsize):
    """Native sublane tile for a dtype: f32 -> 8, bf16 -> 16, int8/fp8 -> 32."""
    return _SUBLANES * max(1, 4 // max(1, int(itemsize)))


def _tile_config():
    """(tile_bytes per input, vmem_limit_bytes), chosen per TPU generation."""
    try:
        info = pltpu.get_tpu_info()
        vmem = int(getattr(info, "vmem_capacity_bytes", 0) or 0)
        if vmem >= 100 * (1 << 20):
            # v5e / v6e: 128 MiB physical VMEM -> big tiles, fewer grid steps.
            return 4 << 20, 64 << 20
    except Exception:
        pass
    # v7x (64 MiB VMEM) or unknown: conservative tiles / scoped limit.
    return 2 << 20, 32 << 20


def _is_small_int(p):
    try:
        q = int(p)
    except Exception:
        return False
    return q == p and 1 <= q <= 16


def _abs_pow(d, p):
    """Elementwise |d|**p; small integer p stays on the VPU (no EUP exp/log)."""
    if p == 2:
        return d * d
    if p == 1:
        return jnp.abs(d)
    if _is_small_int(p):
        q = int(p)
        base = jnp.abs(d) if (q % 2) else d     # even power: sign irrelevant
        out, b, e = None, base, q
        while e:
            if e & 1:
                out = b if out is None else out * b
            e >>= 1
            if e:
                b = b * b
        return out
    return jnp.abs(d) ** p                      # non-integer p: EUP path


def _root(s, p):
    if p == 2:
        return jnp.sqrt(s)
    if p == 1:
        return s
    return s ** (1.0 / p)


# ----------------------------------------------------------------------------
# Kernel: for each (src, tar) body pair, accumulate sum(|tar - src|^p).
# Grid = (cores, steps): axis 0 ("parallel") splits each pair's blocks across
# TensorCores, axis 1 ("arbitrary") streams that core's blocks.  Per-core,
# per-pair partials live in (8,128) vreg-shaped VMEM accumulators (pure VPU
# adds); only the pair's LAST block (if partial) pays the row mask.  On the
# last step each core dumps its lane-dense accumulator; the cross-lane reduce
# and the p-th root happen in the JAX wrapper.
# ----------------------------------------------------------------------------
def _pnorm_body_kernel(*refs, p, metas):
    npair = len(metas)
    in_refs = refs[:2 * npair]
    out_refs = refs[2 * npair:3 * npair]
    acc_refs = refs[3 * npair:]

    c = pl.program_id(0)          # core-split axis ("parallel")
    i = pl.program_id(1)          # sequential streaming axis ("arbitrary")
    steps = pl.num_programs(1)

    @pl.when(i == 0)
    def _():
        for acc in acc_refs:
            acc[...] = jnp.zeros_like(acc)

    for j, (rows, br, blocks, half) in enumerate(metas):
        src_ref = in_refs[2 * j]
        tar_ref = in_refs[2 * j + 1]
        acc_ref = acc_refs[j]
        blk = c * half + i                              # this core's block idx
        valid = jnp.logical_and(blk < blocks, i < half)
        last_is_partial = (blocks * br) != rows         # static

        def _accum(masked, src_ref=src_ref, tar_ref=tar_ref, acc_ref=acc_ref,
                   rows=rows, br=br, blk=blk):
            d = tar_ref[...].astype(jnp.float32) - src_ref[...].astype(jnp.float32)
            v = _abs_pow(d, p)
            if masked:
                # Only the pair's last (partial) block: zero rows past `rows`
                # (they hold undefined pipeline data).
                row_ids = blk * br + lax.broadcasted_iota(jnp.int32, (br, _LANES), 0)
                v = jnp.where(row_ids < rows, v, 0.0)
            # Lane/sublane-preserving partial reduce: VPU-only vreg adds, no
            # cross-lane (XLU) work inside the streaming loop.
            acc_ref[...] += v.reshape(br // _SUBLANES, _SUBLANES, _LANES).sum(axis=0)

        if last_is_partial:
            @pl.when(jnp.logical_and(valid, blk < blocks - 1))
            def _():
                _accum(False)

            @pl.when(jnp.logical_and(valid, blk == blocks - 1))
            def _():
                _accum(True)
        else:
            @pl.when(valid)
            def _():
                _accum(False)

    @pl.when(i == steps - 1)
    def _():
        for j in range(npair):
            out_refs[j][...] = acc_refs[j][...]


def pallas_pnorm_diffs(pairs, p=2, tile_bytes=None):
    """Return [||tar - src||_p for each (src, tar) in pairs] (f32 scalars).

    All sizeable bodies are fused into ONE pallas_call (interleaved per grid
    step).  The 128-aligned body of each tensor is streamed zero-copy; the
    <128-element tail and tensors smaller than one dtype tile are reduced with
    plain jnp and folded in before the p-th root (no padding pass).
    """
    tb_default, vmem_limit = _tile_config()
    if tile_bytes is None:
        tile_bytes = tb_default

    kernel_inputs, in_specs, metas, slots = [], [], [], []

    for (src, tar) in pairs:
        src = jnp.asarray(src)
        tar = jnp.asarray(tar)
        s_flat = src.reshape(-1)
        t_flat = tar.reshape(-1)
        n = int(s_flat.shape[0])
        if int(t_flat.shape[0]) != n:
            raise ValueError("src/tar element counts must match")

        mult = max(_sublane_multiple(s_flat.dtype.itemsize),
                   _sublane_multiple(t_flat.dtype.itemsize))
        rows = n // _LANES
        n_body = rows * _LANES

        if rows < mult:
            # Smaller than one dtype tile: not worth a DMA stream; plain jnp.
            if n == 0:
                slots.append(("const", jnp.float32(0.0)))
            else:
                d = t_flat.astype(jnp.float32) - s_flat.astype(jnp.float32)
                slots.append(("const", jnp.sum(_abs_pow(d, p))))
            continue

        # <128-element tail: tiny plain-jnp fixup instead of a full-array pad.
        if n_body < n:
            d_tail = (t_flat[n_body:].astype(jnp.float32)
                      - s_flat[n_body:].astype(jnp.float32))
            tail_sum = jnp.sum(_abs_pow(d_tail, p))
        else:
            tail_sum = jnp.float32(0.0)

        # TODO(synk): when n % 128 != 0 the body slice below may still cost one
        # XLA copy of the body; a fully copy-free path needs manual DMA of the
        # unaligned tail inside the kernel (overkill for weight tensors).
        s_body = (s_flat if n_body == n else s_flat[:n_body]).reshape(rows, _LANES)
        t_body = (t_flat if n_body == n else t_flat[:n_body]).reshape(rows, _LANES)

        itembytes = max(s_body.dtype.itemsize, t_body.dtype.itemsize)
        cap = max(mult, (tile_bytes // (_LANES * itembytes)) // mult * mult)
        br = (min(rows, cap) // mult) * mult       # >= mult, dtype-tile aligned
        blocks = _cdiv(rows, br)
        half = _cdiv(blocks, _NUM_CORES)           # blocks handled by core 0

        def _make_map(half=half, blocks=blocks):
            def index_map(c, i):
                # Clamp idle steps so the resident block never changes
                # (no redundant DMA on the core/pair that has finished).
                step = jnp.minimum(i, half - 1)
                return (jnp.minimum(c * half + step, blocks - 1), 0)
            return index_map

        spec = pl.BlockSpec((br, _LANES), _make_map())
        kernel_inputs += [s_body, t_body]
        in_specs += [spec, spec]
        slots.append(("kernel", len(metas), tail_sum))
        metas.append((rows, br, blocks, half))

    outs = ()
    if metas:
        npair = len(metas)
        steps = max(m[3] for m in metas)
        out_shape = tuple(
            jax.ShapeDtypeStruct((_NUM_CORES * _SUBLANES, _LANES), jnp.float32)
            for _ in range(npair))
        out_specs = [pl.BlockSpec((_SUBLANES, _LANES), lambda c, i: (c, 0))
                     for _ in range(npair)]
        scratch = [pltpu.VMEM((_SUBLANES, _LANES), jnp.float32)
                   for _ in range(npair)]
        outs = pl.pallas_call(
            functools.partial(_pnorm_body_kernel, p=p, metas=tuple(metas)),
            out_shape=out_shape,
            grid_spec=pltpu.PrefetchScalarGridSpec(
                num_scalar_prefetch=0,
                grid=(_NUM_CORES, steps),
                in_specs=in_specs,
                out_specs=out_specs,
                scratch_shapes=scratch,
            ),
            compiler_params=pltpu.CompilerParams(
                dimension_semantics=("parallel", "arbitrary"),
                vmem_limit_bytes=vmem_limit,
            ),
        )(*kernel_inputs)
        if not isinstance(outs, (tuple, list)):
            outs = (outs,)

    norms = []
    for slot in slots:
        if slot[0] == "const":
            total = slot[1]
        else:
            _, j, tail_sum = slot
            total = jnp.sum(outs[j]) + tail_sum     # cross-lane reduce in JAX
        norms.append(_root(total, p))
    return norms


# ----------------------------------------------------------------------------
# JAX port of the Regularization module.  A "model" is a list of
# (name, array, requires_grad) tuples (stand-in for nn.Module.named_parameters).
# ----------------------------------------------------------------------------
class Regularization:
    def __init__(self, srcmodel, tarmodel, weight_decay, p=2):
        if weight_decay <= 0:
            print('param weight_decay can not <=0')
            sys.exit(0)
        self.srcmodel = srcmodel
        self.tarmodel = tarmodel
        self.weight_decay = weight_decay
        self.p = p
        self.srcweight_list = self.get_newlayer_weight(srcmodel)
        self.tarweight_list = self.get_newlayer_weight(tarmodel)
        self.weight_info(self.srcweight_list)

    def forward(self, srcmodel, tarmodel):
        self.srcweight_list = self.get_newlayer_weight(srcmodel)
        self.tarweight_list = self.get_newlayer_weight(tarmodel)
        oldsrcweight = self.get_old_layer_weight(srcmodel)
        oldtarweight = self.get_old_layer_weight(tarmodel)

        wd = jnp.float32(self.weight_decay)
        pairs, counts = [], []
        # Reference PyTorch re-binds to the LAST 'weight' of each list, so each
        # regularization_loss is len(list) * ||tar_last - src_last||_p.
        if len(self.srcweight_list) > 0:
            pairs.append((self.srcweight_list[-1][1], self.tarweight_list[-1][1]))
            counts.append(len(self.srcweight_list))
        if len(oldsrcweight) > 0:
            pairs.append((oldsrcweight[-1][1], oldtarweight[-1][1]))
            counts.append(len(oldsrcweight))
        if not pairs:
            return jnp.float32(0.0)

        norms = pallas_pnorm_diffs(pairs, p=self.p)   # one fused pallas_call
        loss = jnp.float32(0.0)
        for cnt, nrm in zip(counts, norms):
            loss = loss + wd * (jnp.float32(cnt) * nrm)
        return loss

    def get_newlayer_weight(self, model):
        return [(name, param) for (name, param, req_grad) in model
                if req_grad and ('weight' in name)]

    def get_old_layer_weight(self, model):
        return [(name, param) for (name, param, req_grad) in model
                if (not req_grad) and ('weight' in name)]

    def weight_info(self, weight_list):
        print('---------------regularization weight---------------')
        for name, _ in weight_list:
            print(name)
        print('---------------------------------------------------')


# ----------------------------------------------------------------------------
# Pure-JAX reference (correctness check).
# ----------------------------------------------------------------------------
def _ref_norm(src_w, tar_w, p):
    d = (jnp.asarray(tar_w).astype(jnp.float32)
         - jnp.asarray(src_w).astype(jnp.float32)).ravel()
    return jnp.sum(jnp.abs(d) ** p) ** (1.0 / p)


def _make_model(key):
    # Synthetic "model": frozen (old) conv weight + bias, two trainable (new)
    # weights.  Sizes chosen so the module forward itself exercises the fused
    # two-pair kernel with masked partial last blocks and a <128-element tail.
    k1, k2, k3, k4 = jax.random.split(key, 4)
    return [
        ("backbone.conv.weight", jax.random.normal(k1, (8, 4, 6, 6), jnp.float32), False),
        ("backbone.conv.bias",   jax.random.normal(k2, (8,), jnp.float32),          False),
        ("newhead.conv.weight",  jax.random.normal(k3, (4, 4, 3, 3), jnp.float32),  True),
        ("newhead.fc.weight",    jax.random.normal(k4, (16, 81), jnp.float32),      True),
    ]


if __name__ == "__main__":
    key = jax.random.PRNGKey(0)
    k_src, k_tar, k_big = jax.random.split(key, 3)
    srcmodel = _make_model(k_src)
    tarmodel = _make_model(k_tar)

    weight_decay = 0.01
    p = 2
    reg = Regularization(srcmodel, tarmodel, weight_decay, p=p)

    loss = reg.forward(srcmodel, tarmodel)
    loss = jax.block_until_ready(loss)

    # --- correctness vs. pure-JAX reference (same last-weight semantics) -----
    new_src = reg.get_newlayer_weight(srcmodel)
    new_tar = reg.get_newlayer_weight(tarmodel)
    old_src = reg.get_old_layer_weight(srcmodel)
    old_tar = reg.get_old_layer_weight(tarmodel)
    expected = (
        weight_decay * len(new_src) * _ref_norm(new_src[-1][1], new_tar[-1][1], p)
        + weight_decay * len(old_src) * _ref_norm(old_src[-1][1], old_tar[-1][1], p))
    expected = jax.block_until_ready(expected)
    assert jnp.allclose(loss, expected, rtol=1e-5, atol=1e-4), (loss, expected)

    # --- stress: multi-block, 2-core split with uneven halves, masked partial
    #     last blocks, <128-element tail fixups, two differently-sized pairs ---
    kb = jax.random.split(k_big, 8)
    a_src = jax.random.normal(kb[0], (613, 127), jnp.float32)   # 608 body rows + 27 tail
    a_tar = jax.random.normal(kb[1], (613, 127), jnp.float32)
    b_src = jax.random.normal(kb[2], (37, 40), jnp.float32)     # 11 body rows + 72 tail
    b_tar = jax.random.normal(kb[3], (37, 40), jnp.float32)
    n_a, n_b = pallas_pnorm_diffs([(a_src, a_tar), (b_src, b_tar)],
                                  p=p, tile_bytes=64 << 10)
    n_a, n_b = jax.block_until_ready((n_a, n_b))
    assert jnp.allclose(n_a, _ref_norm(a_src, a_tar, p), rtol=1e-4, atol=1e-4)
    assert jnp.allclose(n_b, _ref_norm(b_src, b_tar, p), rtol=1e-4, atol=1e-4)

    # --- single-kernel-pair call + tail-only (plain jnp) pair, default tiling -
    c_src = jax.random.normal(kb[4], (520, 515), jnp.float32)
    c_tar = jax.random.normal(kb[5], (520, 515), jnp.float32)
    d_src = jax.random.normal(kb[6], (4, 3, 3), jnp.float32)    # 36 elems -> tail-only
    d_tar = jax.random.normal(kb[7], (4, 3, 3), jnp.float32)
    n_c, n_d = pallas_pnorm_diffs([(c_src, c_tar), (d_src, d_tar)], p=p)
    n_c, n_d = jax.block_until_ready((n_c, n_d))
    assert jnp.allclose(n_c, _ref_norm(c_src, c_tar, p), rtol=1e-4, atol=1e-4)
    assert jnp.allclose(n_d, _ref_norm(d_src, d_tar, p), rtol=1e-5, atol=1e-5)

    print("KERNEL_OK")
</pallas_src>

<mosaic_0001>
module attributes {stable_mosaic.version = 11 : i64} {
  func.func @_pnorm_body_kernel(%arg0: i32, %arg1: i32, %arg2: memref<8x128xf32, #tpu.memory_space<vmem>>, %arg3: memref<8x128xf32, #tpu.memory_space<vmem>>, %arg4: memref<8x128xf32, #tpu.memory_space<vmem>>, %arg5: memref<8x128xf32, #tpu.memory_space<vmem>>, %arg6: memref<8x128xf32, #tpu.memory_space<vmem>>, %arg7: memref<8x128xf32, #tpu.memory_space<vmem>>, %arg8: memref<8x128xf32, #tpu.memory_space<vmem>>, %arg9: memref<8x128xf32, #tpu.memory_space<vmem>>) attributes {dimension_semantics = [#tpu.dimension_semantics<parallel>, #tpu.dimension_semantics<arbitrary>], iteration_bounds = array<i64: 2, 1>, scalar_prefetch = 0 : i64, scratch_operands = 2 : i64, tpu.core_type = #tpu.core_type<tc>, window_params = [{transform_indices = @transform_0, window_bounds = array<i64: 8, 128>}, {transform_indices = @transform_1, window_bounds = array<i64: 8, 128>}, {transform_indices = @transform_2, window_bounds = array<i64: 8, 128>}, {transform_indices = @transform_3, window_bounds = array<i64: 8, 128>}, {transform_indices = @transform_4, window_bounds = array<i64: 8, 128>}, {transform_indices = @transform_5, window_bounds = array<i64: 8, 128>}]} {
    %c0_i32 = arith.constant 0 : i32
    %0 = arith.cmpi eq, %arg1, %c0_i32 : i32
    %1 = arith.extui %0 : i1 to i32
    %c0_i32_0 = arith.constant 0 : i32
    %2 = arith.cmpi ne, %1, %c0_i32_0 : i32
    scf.if %2 {
      %cst = arith.constant 0.000000e+00 : f32
      %32 = vector.broadcast %cst : f32 to vector<8x128xf32>
      %c0 = arith.constant 0 : index
      %c0_15 = arith.constant 0 : index
      %33 = vector.load %arg8[%c0, %c0_15] : memref<8x128xf32, #tpu.memory_space<vmem>>, vector<8x128xf32>
      tpu.vector_store %arg8[%c0, %c0_15], %32 {strides = array<i32>} : memref<8x128xf32, #tpu.memory_space<vmem>>, vector<8x128xf32>,
      %cst_16 = arith.constant 0.000000e+00 : f32
      %34 = vector.broadcast %cst_16 : f32 to vector<8x128xf32>
      %c0_17 = arith.constant 0 : index
      %c0_18 = arith.constant 0 : index
      %35 = vector.load %arg9[%c0_17, %c0_18] : memref<8x128xf32, #tpu.memory_space<vmem>>, vector<8x128xf32>
      tpu.vector_store %arg9[%c0_17, %c0_18], %34 {strides = array<i32>} : memref<8x128xf32, #tpu.memory_space<vmem>>, vector<8x128xf32>,
    } else {
    }
    %c1_i32 = arith.constant 1 : i32
    %3 = arith.muli %arg0, %c1_i32 : i32
    %4 = arith.addi %3, %arg1 : i32
    %c2_i32 = arith.constant 2 : i32
    %5 = arith.cmpi slt, %4, %c2_i32 : i32
    %c1_i32_1 = arith.constant 1 : i32
    %6 = arith.cmpi slt, %arg1, %c1_i32_1 : i32
    %7 = arith.andi %5, %6 : i1
    %c1_i32_2 = arith.constant 1 : i32
    %8 = arith.cmpi slt, %4, %c1_i32_2 : i32
    %9 = arith.andi %7, %8 : i1
    %10 = arith.extui %9 : i1 to i32
    %c0_i32_3 = arith.constant 0 : i32
    %11 = arith.cmpi ne, %10, %c0_i32_3 : i32
    scf.if %11 {
      %c0 = arith.constant 0 : index
      %c0_15 = arith.constant 0 : index
      %32 = vector.load %arg3[%c0, %c0_15] : memref<8x128xf32, #tpu.memory_space<vmem>>, vector<8x128xf32>
      %c0_16 = arith.constant 0 : index
      %c0_17 = arith.constant 0 : index
      %33 = vector.load %arg2[%c0_16, %c0_17] : memref<8x128xf32, #tpu.memory_space<vmem>>, vector<8x128xf32>
      %34 = arith.subf %32, %33 : vector<8x128xf32>
      %35 = arith.mulf %34, %34 : vector<8x128xf32>
      %c0_18 = arith.constant 0 : index
      %c0_19 = arith.constant 0 : index
      %36 = vector.load %arg8[%c0_18, %c0_19] : memref<8x128xf32, #tpu.memory_space<vmem>>, vector<8x128xf32>
      %37 = vector.shape_cast %35 : vector<8x128xf32> to vector<1x8x128xf32>
      %cst = arith.constant dense<0.000000e+00> : vector<8x128xf32>
      %38 = vector.multi_reduction <add>, %37, %cst [0] : vector<1x8x128xf32> to vector<8x128xf32>
      %39 = arith.addf %36, %38 : vector<8x128xf32>
      %c0_20 = arith.constant 0 : index
      %c0_21 = arith.constant 0 : index
      %40 = vector.load %arg8[%c0_20, %c0_21] : memref<8x128xf32, #tpu.memory_space<vmem>>, vector<8x128xf32>
      tpu.vector_store %arg8[%c0_20, %c0_21], %39 {strides = array<i32>} : memref<8x128xf32, #tpu.memory_space<vmem>>, vector<8x128xf32>,
    } else {
    }
    %c1_i32_4 = arith.constant 1 : i32
    %12 = arith.cmpi eq, %4, %c1_i32_4 : i32
    %13 = arith.andi %7, %12 : i1
    %14 = arith.extui %13 : i1 to i32
    %c0_i32_5 = arith.constant 0 : i32
    %15 = arith.cmpi ne, %14, %c0_i32_5 : i32
    scf.if %15 {
      %c0 = arith.constant 0 : index
      %c0_15 = arith.constant 0 : index
      %32 = vector.load %arg3[%c0, %c0_15] : memref<8x128xf32, #tpu.memory_space<vmem>>, vector<8x128xf32>
      %c0_16 = arith.constant 0 : index
      %c0_17 = arith.constant 0 : index
      %33 = vector.load %arg2[%c0_16, %c0_17] : memref<8x128xf32, #tpu.memory_space<vmem>>, vector<8x128xf32>
      %34 = arith.subf %32, %33 : vector<8x128xf32>
      %35 = arith.mulf %34, %34 : vector<8x128xf32>
      %c8_i32 = arith.constant 8 : i32
      %36 = arith.muli %4, %c8_i32 : i32
      %37 = tpu.iota {dimensions = array<i32: 0>} : vector<8x128xi32>
      %38 = vector.broadcast %36 : i32 to vector<8x128xi32>
      %39 = arith.addi %38, %37 : vector<8x128xi32>
      %c10_i32 = arith.constant 10 : i32
      %40 = vector.broadcast %c10_i32 : i32 to vector<8x128xi32>
      %41 = arith.cmpi slt, %39, %40 : vector<8x128xi32>
      %cst = arith.constant 0.000000e+00 : f32
      %42 = vector.broadcast %cst : f32 to vector<8x128xf32>
      %43 = arith.select %41, %35, %42 : vector<8x128xi1>, vector<8x128xf32>
      %c0_18 = arith.constant 0 : index
      %c0_19 = arith.constant 0 : index
      %44 = vector.load %arg8[%c0_18, %c0_19] : memref<8x128xf32, #tpu.memory_space<vmem>>, vector<8x128xf32>
      %45 = vector.shape_cast %43 : vector<8x128xf32> to vector<1x8x128xf32>
      %cst_20 = arith.constant dense<0.000000e+00> : vector<8x128xf32>
      %46 = vector.multi_reduction <add>, %45, %cst_20 [0] : vector<1x8x128xf32> to vector<8x128xf32>
      %47 = arith.addf %44, %46 : vector<8x128xf32>
      %c0_21 = arith.constant 0 : index
      %c0_22 = arith.constant 0 : index
      %48 = vector.load %arg8[%c0_21, %c0_22] : memref<8x128xf32, #tpu.memory_space<vmem>>, vector<8x128xf32>
      tpu.vector_store %arg8[%c0_21, %c0_22], %47 {strides = array<i32>} : memref<8x128xf32, #tpu.memory_space<vmem>>, vector<8x128xf32>,
    } else {
    }
    %c1_i32_6 = arith.constant 1 : i32
    %16 = arith.muli %arg0, %c1_i32_6 : i32
    %17 = arith.addi %16, %arg1 : i32
    %c2_i32_7 = arith.constant 2 : i32
    %18 = arith.cmpi slt, %17, %c2_i32_7 : i32
    %c1_i32_8 = arith.constant 1 : i32
    %19 = arith.cmpi slt, %arg1, %c1_i32_8 : i32
    %20 = arith.andi %18, %19 : i1
    %c1_i32_9 = arith.constant 1 : i32
    %21 = arith.cmpi slt, %17, %c1_i32_9 : i32
    %22 = arith.andi %20, %21 : i1
    %23 = arith.extui %22 : i1 to i32
    %c0_i32_10 = arith.constant 0 : i32
    %24 = arith.cmpi ne, %23, %c0_i32_10 : i32
    scf.if %24 {
      %c0 = arith.constant 0 : index
      %c0_15 = arith.constant 0 : index
      %32 = vector.load %arg5[%c0, %c0_15] : memref<8x128xf32, #tpu.memory_space<vmem>>, vector<8x128xf32>
      %c0_16 = arith.constant 0 : index
      %c0_17 = arith.constant 0 : index
      %33 = vector.load %arg4[%c0_16, %c0_17] : memref<8x128xf32, #tpu.memory_space<vmem>>, vector<8x128xf32>
      %34 = arith.subf %32, %33 : vector<8x128xf32>
      %35 = arith.mulf %34, %34 : vector<8x128xf32>
      %c0_18 = arith.constant 0 : index
      %c0_19 = arith.constant 0 : index
      %36 = vector.load %arg9[%c0_18, %c0_19] : memref<8x128xf32, #tpu.memory_space<vmem>>, vector<8x128xf32>
      %37 = vector.shape_cast %35 : vector<8x128xf32> to vector<1x8x128xf32>
      %cst = arith.constant dense<0.000000e+00> : vector<8x128xf32>
      %38 = vector.multi_reduction <add>, %37, %cst [0] : vector<1x8x128xf32> to vector<8x128xf32>
      %39 = arith.addf %36, %38 : vector<8x128xf32>
      %c0_20 = arith.constant 0 : index
      %c0_21 = arith.constant 0 : index
      %40 = vector.load %arg9[%c0_20, %c0_21] : memref<8x128xf32, #tpu.memory_space<vmem>>, vector<8x128xf32>
      tpu.vector_store %arg9[%c0_20, %c0_21], %39 {strides = array<i32>} : memref<8x128xf32, #tpu.memory_space<vmem>>, vector<8x128xf32>,
    } else {
    }
    %c1_i32_11 = arith.constant 1 : i32
    %25 = arith.cmpi eq, %17, %c1_i32_11 : i32
    %26 = arith.andi %20, %25 : i1
    %27 = arith.extui %26 : i1 to i32
    %c0_i32_12 = arith.constant 0 : i32
    %28 = arith.cmpi ne, %27, %c0_i32_12 : i32
    scf.if %28 {
      %c0 = arith.constant 0 : index
      %c0_15 = arith.constant 0 : index
      %32 = vector.load %arg5[%c0, %c0_15] : memref<8x128xf32, #tpu.memory_space<vmem>>, vector<8x128xf32>
      %c0_16 = arith.constant 0 : index
      %c0_17 = arith.constant 0 : index
      %33 = vector.load %arg4[%c0_16, %c0_17] : memref<8x128xf32, #tpu.memory_space<vmem>>, vector<8x128xf32>
      %34 = arith.subf %32, %33 : vector<8x128xf32>
      %35 = arith.mulf %34, %34 : vector<8x128xf32>
      %c8_i32 = arith.constant 8 : i32
      %36 = arith.muli %17, %c8_i32 : i32
      %37 = tpu.iota {dimensions = array<i32: 0>} : vector<8x128xi32>
      %38 = vector.broadcast %36 : i32 to vector<8x128xi32>
      %39 = arith.addi %38, %37 : vector<8x128xi32>
      %c9_i32 = arith.constant 9 : i32
      %40 = vector.broadcast %c9_i32 : i32 to vector<8x128xi32>
      %41 = arith.cmpi slt, %39, %40 : vector<8x128xi32>
      %cst = arith.constant 0.000000e+00 : f32
      %42 = vector.broadcast %cst : f32 to vector<8x128xf32>
      %43 = arith.select %41, %35, %42 : vector<8x128xi1>, vector<8x128xf32>
      %c0_18 = arith.constant 0 : index
      %c0_19 = arith.constant 0 : index
      %44 = vector.load %arg9[%c0_18, %c0_19] : memref<8x128xf32, #tpu.memory_space<vmem>>, vector<8x128xf32>
      %45 = vector.shape_cast %43 : vector<8x128xf32> to vector<1x8x128xf32>
      %cst_20 = arith.constant dense<0.000000e+00> : vector<8x128xf32>
      %46 = vector.multi_reduction <add>, %45, %cst_20 [0] : vector<1x8x128xf32> to vector<8x128xf32>
      %47 = arith.addf %44, %46 : vector<8x128xf32>
      %c0_21 = arith.constant 0 : index
      %c0_22 = arith.constant 0 : index
      %48 = vector.load %arg9[%c0_21, %c0_22] : memref<8x128xf32, #tpu.memory_space<vmem>>, vector<8x128xf32>
      tpu.vector_store %arg9[%c0_21, %c0_22], %47 {strides = array<i32>} : memref<8x128xf32, #tpu.memory_space<vmem>>, vector<8x128xf32>,
    } else {
    }
    %c0_i32_13 = arith.constant 0 : i32
    %29 = arith.cmpi eq, %arg1, %c0_i32_13 : i32
    %30 = arith.extui %29 : i1 to i32
    %c0_i32_14 = arith.constant 0 : i32
    %31 = arith.cmpi ne, %30, %c0_i32_14 : i32
    scf.if %31 {
      %c0 = arith.constant 0 : index
      %c0_15 = arith.constant 0 : index
      %32 = vector.load %arg8[%c0, %c0_15] : memref<8x128xf32, #tpu.memory_space<vmem>>, vector<8x128xf32>
      %c0_16 = arith.constant 0 : index
      %c0_17 = arith.constant 0 : index
      %33 = vector.load %arg6[%c0_16, %c0_17] : memref<8x128xf32, #tpu.memory_space<vmem>>, vector<8x128xf32>
      tpu.vector_store %arg6[%c0_16, %c0_17], %32 {strides = array<i32>} : memref<8x128xf32, #tpu.memory_space<vmem>>, vector<8x128xf32>,
      %c0_18 = arith.constant 0 : index
      %c0_19 = arith.constant 0 : index
      %34 = vector.load %arg9[%c0_18, %c0_19] : memref<8x128xf32, #tpu.memory_space<vmem>>, vector<8x128xf32>
      %c0_20 = arith.constant 0 : index
      %c0_21 = arith.constant 0 : index
      %35 = vector.load %arg7[%c0_20, %c0_21] : memref<8x128xf32, #tpu.memory_space<vmem>>, vector<8x128xf32>
      tpu.vector_store %arg7[%c0_20, %c0_21], %34 {strides = array<i32>} : memref<8x128xf32, #tpu.memory_space<vmem>>, vector<8x128xf32>,
    } else {
    }
    return
  }
  func.func @transform_0(%arg0: i32, %arg1: i32) -> (i32, i32) {
    %c0_i32 = arith.constant 0 : i32
    %0 = arith.minsi %arg1, %c0_i32 : i32
    %c1_i32 = arith.constant 1 : i32
    %1 = arith.muli %arg0, %c1_i32 : i32
    %2 = arith.addi %1, %0 : i32
    %c1_i32_0 = arith.constant 1 : i32
    %3 = arith.minsi %2, %c1_i32_0 : i32
    %c0_i32_1 = arith.constant 0 : i32
    %c0_i32_2 = arith.constant 0 : i32
    return %3, %c0_i32_1 : i32, i32
  }
  func.func @transform_1(%arg0: i32, %arg1: i32) -> (i32, i32) {
    %c0_i32 = arith.constant 0 : i32
    %0 = arith.minsi %arg1, %c0_i32 : i32
    %c1_i32 = arith.constant 1 : i32
    %1 = arith.muli %arg0, %c1_i32 : i32
    %2 = arith.addi %1, %0 : i32
    %c1_i32_0 = arith.constant 1 : i32
    %3 = arith.minsi %2, %c1_i32_0 : i32
    %c0_i32_1 = arith.constant 0 : i32
    %c0_i32_2 = arith.constant 0 : i32
    return %3, %c0_i32_1 : i32, i32
  }
  func.func @transform_2(%arg0: i32, %arg1: i32) -> (i32, i32) {
    %c0_i32 = arith.constant 0 : i32
    %0 = arith.minsi %arg1, %c0_i32 : i32
    %c1_i32 = arith.constant 1 : i32
    %1 = arith.muli %arg0, %c1_i32 : i32
    %2 = arith.addi %1, %0 : i32
    %c1_i32_0 = arith.constant 1 : i32
    %3 = arith.minsi %2, %c1_i32_0 : i32
    %c0_i32_1 = arith.constant 0 : i32
    %c0_i32_2 = arith.constant 0 : i32
    return %3, %c0_i32_1 : i32, i32
  }
  func.func @transform_3(%arg0: i32, %arg1: i32) -> (i32, i32) {
    %c0_i32 = arith.constant 0 : i32
    %0 = arith.minsi %arg1, %c0_i32 : i32
    %c1_i32 = arith.constant 1 : i32
    %1 = arith.muli %arg0, %c1_i32 : i32
    %2 = arith.addi %1, %0 : i32
    %c1_i32_0 = arith.constant 1 : i32
    %3 = arith.minsi %2, %c1_i32_0 : i32
    %c0_i32_1 = arith.constant 0 : i32
    %c0_i32_2 = arith.constant 0 : i32
    return %3, %c0_i32_1 : i32, i32
  }
  func.func @transform_4(%arg0: i32, %arg1: i32) -> (i32, i32) {
    %c0_i32 = arith.constant 0 : i32
    %c0_i32_0 = arith.constant 0 : i32
    return %arg0, %c0_i32 : i32, i32
  }
  func.func @transform_5(%arg0: i32, %arg1: i32) -> (i32, i32) {
    %c0_i32 = arith.constant 0 : i32
    %c0_i32_0 = arith.constant 0 : i32
    return %arg0, %c0_i32 : i32, i32
  }
}

</mosaic_0001>

<bundles_post_ra>
// kernel: tpu_custom_call.1
= control target key start
LH: loop header
LB: loop body
LE: loop exit
PB: predicated region body
PF: predicated region fallthrough
CT: control target
= control target key end

     0   :  { %s1469_s0 = inlined_call_operand.hbm [shape: f32[10,128], index: 0, kind: input, shape index: {}]   ;;  %s1470_s1 = inlined_call_operand.hbm [shape: f32[10,128], index: 1, kind: input, shape index: {}]   ;;  %s1471_s2 = inlined_call_operand.hbm [shape: f32[9,128], index: 2, kind: input, shape index: {}]   ;;  %s1472_s3 = inlined_call_operand.hbm [shape: f32[9,128], index: 3, kind: input, shape index: {}]   ;;  %s1473_s4 = inlined_call_operand.hbm [shape: f32[16,128], index: 4, kind: output, shape index: {0}]   ;;  %s1474_s5 = inlined_call_operand.hbm [shape: f32[16,128], index: 5, kind: output, shape index: {1}]  }
   0x1   :  { %1479 = sst [smem:[#allocation26_spill]] %s1469_s0 }
   0x2   :  { %1480 = sst [smem:[#allocation27_spill]] %s1470_s1 }
   0x3   :  { %11 = vsyncpa [#allocation5], 0 }
   0x4   :  { %13 = vsyncpa [#allocation5 + $0x1], 0 }
   0x5   :  { %14 = vsyncpa [#allocation8], 0 }
   0x6   :  { %16 = vsyncpa [#allocation8 + $0x1], 0 }
   0x7   :  { %17 = vsyncpa [#allocation11], 0 }
   0x8   :  { %19 = vsyncpa [#allocation11 + $0x1], 0 }
   0x9   :  { %20 = vsyncpa [#allocation6], 0 }
   0xa   :  { %22 = vsyncpa [#allocation6 + $0x1], 0 }
   0xb   :  { %23 = vsyncpa [#allocation14], 0 }
   0xc   :  { %25 = vsyncpa [#allocation14 + $0x1], 0  ;;  %s1166_s18 = smov 0   ;;  %s1168_s19 = smov 0  }
   0xd   :  { %s1170_s20 = smov 0   ;;  %s1172_s21 = smov 0  }
   0xe   :  { %s1174_s22 = smov 0   ;;  %s1176_s23 = smov 0  }
   0xf   :  { %s1178_s24 = smov 0   ;;  %s1180_s25 = smov 0  }
  0x10   :  { %s1182_s26 = smov 0  }
  0x11 LB: > { %1481 = sst [smem:[#allocation20_spill]] %s1103_s20  ;;  %s1210_s27 = sadd.s32 4294967295, %s1127_s26   ;;  %s1127_s26 = sphi %s1182_s26, %s31_s26   ;;  %s1123_s25 = sphi %s1180_s25, %s1503_s25   ;;  %s1119_s24 = sphi %s1178_s24, %s1502_s24   ;;  %s1115_s23 = sphi %s1176_s23, %s1501_s23   ;;  %s1111_s22 = sphi %s1174_s22, %s1507_s22   ;;  %s1107_s21 = sphi %s1172_s21, %s1506_s21   ;;  %s1103_s20 = sphi %s1170_s20, %s1499_s20   ;;  %s1099_s19 = sphi %s1168_s19, %s1505_s19   ;;  %s1095_s18 = sphi %s1166_s18, %s1504_s18  }
  0x12   : > { %1482 = sst [smem:[#allocation21_spill]] %s1115_s23  ;;  %s738_s28 = sadd.s32 4294967294, %s1127_s26  }
  0x13   : > { %1483 = sst [smem:[#allocation22_spill]] %s1123_s25  ;;  %s43_s29 = sadd.s32 1, %s1123_s25 }
  0x14   : > { %p50_p0 = scmp.lt.s32.totalorder %s1123_s25, 1  ;;  %p45_p1 = scmp.ge.s32.totalorder %s43_s29, 2 }
  0x15   : > { %s60_s30 = sadd.s32 1, %s1115_s23  ;;  %p67_p2 = scmp.ne.s32.totalorder %s1115_s23, %s1111_s22 }
  0x16   : > { %s51_s6 = scalar_select %p50_p0, %s1123_s25, 1 }
  0x17   : > { %s1509_s29 = smov (%p45_p1, %s43_s29), 0  ;;  %p68_p3 = scmp.eq.s32.totalorder %s1127_s26, 0 }
  0x18   : > { %1484 = sst [smem:[#allocation23_spill]] %s1509_s29  ;;  %p55_p4 = scmp.lt.s32.totalorder %s1509_s29, 1 }
  0x19   : > { %p73_p5 = scmp.ne.s32.totalorder %s1111_s22, %s1107_s21  ;;  %p1224_p6 = por %p68_p3, %p67_p2 }
  0x1a   : > { %p74_p7 = scmp.eq.s32.totalorder %s1210_s27, 0  ;;  %s191_s10 = ssub.s32 %s1123_s25, %s1509_s29 }
  0x1b   : > { %s56_s8 = scalar_select %p55_p4, %s1509_s29, 1 }
  0x1c   : > { %p1230_p8 = por %p74_p7, %p73_p5  ;;  %p192_p9 = scmp.eq.s32.totalorder %s191_s10, 0 }
  0x1d   : > { %s57_s11 = ssub.s32 %s51_s6, %s56_s8  ;;  %s194_s12 = sadd.s32 1, %s1103_s20 }
  0x1e   : > { %p58_p10 = scmp.eq.s32.totalorder %s57_s11, 0  ;;  %p204_p11 = scmp.ne.s32.totalorder %s1103_s20, %s1099_s19 }
  0x1f   : > { %s1238_s13 = scalar_select %p192_p9, %s1103_s20, %s194_s12  }
  0x20   : > { %s1241_s14 = scalar_select %p58_p10, %s1115_s23, %s60_s30  }
  0x21   : > { %1487 = sst [smem:[#allocation24_spill]] %s1238_s13  ;;  %p205_p12 = scmp.eq.s32.totalorder %s1210_s27, 1 }
  0x22   : > { %1488 = sst [smem:[#allocation25_spill]] %s1241_s14  ;;  %p210_p13 = scmp.ne.s32.totalorder %s1099_s19, %s1095_s18 }
  0x23   : > { %p211_p0 = scmp.eq.s32.totalorder %s738_s28, 1  ;;  %p1248_p1 = por %p205_p12, %p204_p11 }
  0x24   : > { %p798_p4 = scmp.lt.s32.totalorder %s1127_s26, 2  ;;  %s1259_s17 = sand.u32 1, %s1115_s23  }
  0x25   : > { %p1253_p3 = por %p211_p0, %p210_p13  ;;  %s1261_s21 = sshll.u32 %s51_s6, 7 }
  0x26   : > { %s1264_s30 = sshll.u32 %s1259_s17, 3  ;;  %p1268_p5 = pnand %p798_p4, %p1224_p6 }
  0x27   : > { %s280_s8 = sand.u32 1, %s1127_s26   ;;  %s1492_s1 = sld [smem:[#allocation27_spill]] }
  0x28   : > { %s284_s29 = scalar_lea.vmem [#allocation7], %s1264_s30  ;;  %p749_p7 = scmp.ge.s32.totalorder %s1127_s26, 1 }
  0x29   : > { %s296_s25 = sshll.u32 %s284_s29, 4  ;;  %s1279_s6 = scalar_lea.sflag [#allocation8], %s280_s8  ;;  %s297_s25 = int_to_ptr.vmem [resolvable:$true] %s296_s25 }
  0x2a   : > { %p875_p9 = pneg %p1268_p5  ;;  %s886_s7 = scalar_lea.vmem %s297_s25, 128 }
  0x2b   : > { %p887_p6 = scmp.ne.s32.totalorder %s297_s25, %s886_s7  ;;  %s1129_s14 = smov [#allocation7]  }
  0x2c   : > { %s891_s23 = sshll.u32 %s1129_s14, 4  ;;  %s892_s23 = int_to_ptr.vmem [resolvable:$false] %s891_s23 }
  0x2d   : > { %s294_s12 = scalar_lea.hbm %s1492_s1, %s1261_s21  ;;  %p889_p10 = pnand %p887_p6, %p875_p9 }
  0x2e   : > { %s893_s13 = scalar_lea.vmem %s892_s23, 256  ;;  %p894_p12 = scmp.lt.s32.totalorder %s297_s25, %s892_s23 }
  0x2f   : > { %p890_p11 = pneg %p889_p10  ;;  %p895_p13 = scmp.lt.s32.totalorder %s893_s13, %s886_s7 }
  0x31   : > { %p896_p0 = por %p895_p13, %p894_p12 }
  0x33   : > { %p897_p4 = pnand %p896_p0, %p890_p11 }
  0x35   : > { %900 = shalt.err (!%p897_p4)
}
  0x36   : > { %784 = dma.hbm_to_vmem [thread:$0]  (!%p1268_p5), %s294_s12, 128, %s297_s25, %s1279_s6  }
  0x37   : > { %p347_p6 = scmp.lt.s32.totalorder %s1127_s26, 3  ;;  %s1494_s0 = sld [smem:[#allocation26_spill]] }
  0x38   : > { %s261_s8 = scalar_lea.vmem [#allocation4], %s1264_s30  ;;  %s258_s11 = scalar_lea.sflag [#allocation5], %s1259_s17 }
  0x39   : > { %p1292_p10 = pnand %p749_p7, %p347_p6  ;;  %s273_s10 = sshll.u32 %s261_s8, 4  ;;  %s274_s10 = int_to_ptr.vmem [resolvable:$true] %s273_s10 }
  0x3a   : > { %s914_s7 = scalar_lea.vmem %s274_s10, 128  ;;  %s1130_s25 = smov [#allocation4]  }
  0x3b   : > { %p915_p11 = scmp.ne.s32.totalorder %s274_s10, %s914_s7  ;;  %s919_s12 = sshll.u32 %s1130_s25, 4  ;;  %s920_s12 = int_to_ptr.vmem [resolvable:$false] %s919_s12 }
  0x3c   : > { %s921_s1 = scalar_lea.vmem %s920_s12, 256  ;;  %p922_p7 = scmp.lt.s32.totalorder %s274_s10, %s920_s12 }
  0x3d   : > { %s271_s14 = scalar_lea.hbm %s1494_s0, %s1261_s21  ;;  %p917_p12 = pnand %p915_p11, %p875_p9 }
  0x3e   : > { %p923_p0 = scmp.lt.s32.totalorder %s921_s1, %s914_s7 }
  0x3f   : > { %p918_p13 = pneg %p917_p12 }
  0x40   : > { %p924_p4 = por %p923_p0, %p922_p7 }
  0x42   : > { %p925_p6 = pnand %p924_p4, %p918_p13 }
  0x44   : > { %928 = shalt.err (!%p925_p6)
}
  0x45   : > { %781 = dma.hbm_to_vmem [thread:$0]  (!%p1268_p5), %s271_s14, 128, %s274_s10, %s258_s11  }
  0x46   : > { %s317_s8 = scalar_lea.hbm %s1471_s2, %s1261_s21  ;;  %s307_s0 = scalar_lea.vmem [#allocation9], %s1264_s30 }
  0x47   : > { %s319_s20 = sshll.u32 %s307_s0, 4  ;;  %s1131_s1 = smov [#allocation9]   ;;  %s320_s20 = int_to_ptr.vmem [resolvable:$true] %s319_s20 }
  0x48   : > { %s942_s25 = scalar_lea.vmem %s320_s20, 128  ;;  %s947_s7 = sshll.u32 %s1131_s1, 4  ;;  %s948_s7 = int_to_ptr.vmem [resolvable:$false] %s947_s7 }
  0x49   : > { %p943_p11 = scmp.ne.s32.totalorder %s320_s20, %s942_s25  ;;  %s949_s12 = scalar_lea.vmem %s948_s7, 256 }
  0x4a   : > { %p950_p7 = scmp.lt.s32.totalorder %s320_s20, %s948_s7  ;;  %p951_p0 = scmp.lt.s32.totalorder %s949_s12, %s942_s25 }
  0x4b   : > { %p945_p12 = pnand %p943_p11, %p875_p9 }
  0x4c   : > { %p952_p4 = por %p951_p0, %p950_p7 }
  0x4d   : > { %p946_p13 = pneg %p945_p12 }
  0x4f   : > { %p953_p6 = pnand %p952_p4, %p946_p13 }
  0x51   : > { %956 = shalt.err (!%p953_p6)
}
  0x52   : > { %787 = dma.hbm_to_vmem [thread:$0]  (!%p1268_p5), %s317_s8, 128, %s320_s20, %s1279_s6  }
  0x53   : > { %s340_s10 = scalar_lea.hbm %s1472_s3, %s1261_s21  ;;  %s330_s11 = scalar_lea.vmem [#allocation10], %s1264_s30 }
  0x54   : > { %s342_s23 = sshll.u32 %s330_s11, 4  ;;  %s327_s13 = scalar_lea.sflag [#allocation11], %s1259_s17  ;;  %s343_s23 = int_to_ptr.vmem [resolvable:$true] %s342_s23 }
  0x55   : > { %s970_s25 = scalar_lea.vmem %s343_s23, 128  ;;  %s1132_s1 = smov [#allocation10]  }
  0x56   : > { %p971_p11 = scmp.ne.s32.totalorder %s343_s23, %s970_s25  ;;  %s975_s7 = sshll.u32 %s1132_s1, 4  ;;  %s976_s7 = int_to_ptr.vmem [resolvable:$false] %s975_s7 }
  0x57   : > { %s977_s12 = scalar_lea.vmem %s976_s7, 256  ;;  %p978_p7 = scmp.lt.s32.totalorder %s343_s23, %s976_s7 }
  0x58   : > { %p973_p12 = pnand %p971_p11, %p875_p9  ;;  %p979_p0 = scmp.lt.s32.totalorder %s977_s12, %s970_s25 }
  0x5a   : > { %p974_p13 = pneg %p973_p12  ;;  %p980_p4 = por %p979_p0, %p978_p7 }
  0x5c   : > { %p981_p6 = pnand %p980_p4, %p974_p13 }
  0x5e   : > { %984 = shalt.err (!%p981_p6)
}
  0x5f   : > { %790 = dma.hbm_to_vmem [thread:$0]  (!%p1268_p5), %s340_s10, 128, %s343_s23, %s327_s13  }
  0x60   : > { %351 = sbr.rel (%p1292_p10) target bundleno = 221 (0xdd), region = 36  ;;  %s353_s20 = sand.u32 (!%p1292_p10), 1, %s1111_s22  }
  0x61   : > { %s1332_s17 = sshll.u32 (!%p1292_p10), %s353_s20, 3  ;;  %s354_s21 = scalar_lea.sflag (!%p1292_p10), [#allocation5], %s353_s20 }
  0x62   : > { %s357_s30 = scalar_lea.vmem (!%p1292_p10), [#allocation4], %s1332_s17 }
  0x65   : > { %1074 = dma.done.wait (%p1230_p8), %s354_s21, 128  }
  0x66   : > { %1076 = vsyncadd (%p1230_p8), %s354_s21, 4294967168  ;;  %s362_s28 = sand.u32 1, %s1210_s27   ;;  %s366_s29 = scalar_lea.vmem [#allocation7], %s1332_s17 }
  0x67   : > { %s363_s6 = scalar_lea.sflag [#allocation8], %s362_s28 }
  0x68   : > { %1078 = dma.done.wait (%p1230_p8), %s363_s6, 256  }
  0x69   : > { %1080 = vsyncadd (%p1230_p8), %s363_s6, 4294967040  ;;  %s375_s8 = scalar_lea.vmem [#allocation9], %s1332_s17  ;;  %s381_s0 = scalar_lea.sflag [#allocation11], %s353_s20 }
  0x6a   : > { %s384_s14 = scalar_lea.vmem [#allocation10], %s1332_s17 }
  0x6b   : > { %1082 = dma.done.wait (%p1230_p8), %s381_s0, 128  }
  0x6c   : > { %1084 = vsyncadd (%p1230_p8), %s381_s0, 4294967168  ;;  %s1352_s27 = sand.u32 1, %s1099_s19   ;;  %p458_p5 = scmp.lt.s32.totalorder %s1119_s24, 2  ;;  %v1133_v0 = vmov 0.0  }
  0x6d   : > { %s754_s10 = sshll.u32 %s1352_s27, 3  ;;  %455 = vst [vmem:[#allocation2] sm:$0xff] %v1133_v0  ;;  %456 = vst [vmem:[#allocation3] sm:$0xff] %v1133_v0  ;;  %p462_p9 = scmp.lt.s32.totalorder %s1119_s24, 1 }
  0x6e   : > { %s1363_s9 = scalar_lea.vmem [#allocation12], %s754_s10  ;;  %s1365_s23 = scalar_lea.vmem [#allocation13], %s754_s10 }
  0x6f   : > { %p1359_p10 = pnand %p462_p9, %p458_p5 }
  0x71   : > { %466 = sbr.rel (%p1359_p10) target bundleno = 126 (0x7e), region = 60 }
  0x76   : > { %v467_v1 = vld [vmem:[%s366_s29] sm:$0xff]  ;;  %v468_v2 = vld [vmem:[%s357_s30] sm:$0xff] }
  0x77   : > { %v469_v3 = vsub.f32 %v467_v1, %v468_v2  ;;  %v471_v4 = vld [vmem:[#allocation2] sm:$0xff] }
  0x79   : > { %v470_v5 = vmul.f32 %v469_v3, %v469_v3 }
  0x7b   : > { %v473_v6 = vadd.f32 %v471_v4, %v470_v5 }
  0x7d   : > { %474 = vst [vmem:[#allocation2] sm:$0xff] %v473_v6 }
  0x7e PF: > { %p475_p8 = scmp.eq.s32.totalorder %s1119_s24, 1 }
  0x80   : > { %p1374_p11 = pnand %p475_p8, %p458_p5 }
  0x81   : > { %s757_s25 = sshll.u32 (!%p1374_p11), %s1119_s24, 3 }
  0x82   : > { %479 = sbr.rel (%p1374_p11) target bundleno = 146 (0x92), region = 64 }
  0x87   : > { %v480_v7 = vld [vmem:[%s366_s29] sm:$0xff]  ;;  %v481_v8 = vld [vmem:[%s357_s30] sm:$0xff]  ;;  %v485_v9 = vlaneseq  ;;  %v487_v11 = vstv %s757_s25 }
  0x88   : > { %v482_v10 = vsub.f32 %v480_v7, %v481_v8  ;;  %v491_v15 = vld [vmem:[#allocation2] sm:$0xff] }
  0x89   : > { %v486_v12 = vshrl.u32 %v485_v9, 7 }
  0x8a   : > { %v483_v13 = vmul.f32 %v482_v10, %v482_v10 }
  0x8b   : > { %v488_v14 = vadd.s32 %v487_v11, %v486_v12 }
  0x8d   : > { %vm489_vm0 = vcmp.lt.s32.totalorder %v488_v14, 10 }
  0x8e   : > { %v490_v16 = vsel %vm489_vm0, %v483_v13, 0.0 }
  0x8f   : > { %v493_v17 = vadd.f32 %v491_v15, %v490_v16 }
  0x91   : > { %494 = vst [vmem:[#allocation2] sm:$0xff] %v493_v17 }
  0x92 PF: > { %496 = sbr.rel (%p1359_p10) target bundleno = 159 (0x9f), region = 68 }
  0x97   : > { %v497_v18 = vld [vmem:[%s384_s14] sm:$0xff]  ;;  %v498_v19 = vld [vmem:[%s375_s8] sm:$0xff] }
  0x98   : > { %v499_v20 = vsub.f32 %v497_v18, %v498_v19  ;;  %v501_v21 = vld [vmem:[#allocation3] sm:$0xff] }
  0x9a   : > { %v500_v22 = vmul.f32 %v499_v20, %v499_v20 }
  0x9c   : > { %v503_v23 = vadd.f32 %v501_v21, %v500_v22 }
  0x9e   : > { %504 = vst [vmem:[#allocation3] sm:$0xff] %v503_v23 }
  0x9f PF: > { %506 = sbr.rel (%p1374_p11) target bundleno = 175 (0xaf), region = 72  ;;  %s758_s1 = sshll.u32 (!%p1374_p11), %s1119_s24, 3 }
  0xa4   : > { %v507_v24 = vld [vmem:[%s384_s14] sm:$0xff]  ;;  %v508_v25 = vld [vmem:[%s375_s8] sm:$0xff]  ;;  %v512_v26 = vlaneseq  ;;  %v514_v28 = vstv %s758_s1 }
  0xa5   : > { %v509_v27 = vsub.f32 %v507_v24, %v508_v25  ;;  %v518_v32 = vld [vmem:[#allocation3] sm:$0xff] }
  0xa6   : > { %v513_v29 = vshrl.u32 %v512_v26, 7 }
  0xa7   : > { %v510_v30 = vmul.f32 %v509_v27, %v509_v27 }
  0xa8   : > { %v515_v31 = vadd.s32 %v514_v28, %v513_v29 }
  0xaa   : > { %vm516_vm1 = vcmp.lt.s32.totalorder %v515_v31, 9 }
  0xab   : > { %v517_v33 = vsel %vm516_vm1, %v510_v30, 0.0 }
  0xac   : > { %v520_v34 = vadd.f32 %v518_v32, %v517_v33 }
  0xae   : > { %521 = vst [vmem:[#allocation3] sm:$0xff] %v520_v34 }
  0xaf PF: > { %v525_v35 = vld [vmem:[#allocation2] sm:$0xff]  ;;  %s761_s7 = sshll.u32 %s1119_s24, 7  ;;  %s548_s21 = sshll.u32 %s1363_s9, 4  ;;  %s549_s21 = int_to_ptr.vmem [resolvable:$true] %s548_s21 }
  0xb0   : > { %526 = vst [vmem:[%s1363_s9] sm:$0xff] %v525_v35  ;;  %s546_s17 = scalar_lea.hbm %s1473_s4, %s761_s7  ;;  %s530_s30 = scalar_lea.sflag [#allocation6], %s1352_s27 }
  0xb1   : > { %s985_s28 = scalar_lea.vmem %s549_s21, 128  ;;  %s1134_s6 = smov [#allocation12]  }
  0xb2   : > { %p986_p12 = scmp.ne.s32.totalorder %s549_s21, %s985_s28  ;;  %s989_s29 = sshll.u32 %s1134_s6, 4  ;;  %s990_s29 = int_to_ptr.vmem [resolvable:$false] %s989_s29 }
  0xb3   : > { %s991_s8 = scalar_lea.vmem %s990_s29, 256  ;;  %p992_p0 = scmp.lt.s32.totalorder %s549_s21, %s990_s29 }
  0xb4   : > { %p987_p13 = pnand %p986_p12, %p1248_p1  ;;  %p993_p4 = scmp.lt.s32.totalorder %s991_s8, %s985_s28 }
  0xb5   : > { %v527_v36 = vld [vmem:[#allocation3] sm:$0xff] }
  0xb6   : > { %528 = vst [vmem:[%s1365_s23] sm:$0xff] %v527_v36  ;;  %p988_p7 = pneg %p987_p13  ;;  %p994_p6 = por %p993_p4, %p992_p0 }
  0xb8   : > { %p995_p5 = pnand %p994_p6, %p988_p7 }
  0xba   : > { %998 = shalt.err (!%p995_p5)
}
  0xbb   : > { %s999_s0 = scalar_lea.hbm %s546_s17, 128  ;;  %s1003_s11 = scalar_lea.hbm %s1473_s4, 256 }
  0xbc   : > { %p1000_p9 = scmp.ne.s32.totalorder %s546_s17, %s999_s0  ;;  %p1004_p11 = scmp.lt.s32.totalorder %s546_s17, %s1473_s4 }
  0xbd   : > { %p1005_p12 = scmp.lt.s32.totalorder %s1003_s11, %s999_s0 }
  0xbe   : > { %p1001_p10 = pnand %p1000_p9, %p1248_p1 }
  0xbf   : > { %p1006_p13 = por %p1005_p12, %p1004_p11 }
  0xc0   : > { %p1002_p8 = pneg %p1001_p10 }
  0xc2   : > { %p1007_p2 = pnand %p1006_p13, %p1002_p8 }
  0xc4   : > { %1010 = shalt.err (!%p1007_p2)
}
  0xc5   : > { %774 = dma.vmem_to_hbm [thread:$0]  (%p1248_p1), %s549_s21, 128, %s546_s17, %s530_s30  }
  0xc6   : > { %s559_s12 = scalar_lea.hbm %s1474_s5, %s761_s7  ;;  %s561_s20 = sshll.u32 %s1365_s23, 4  ;;  %s562_s20 = int_to_ptr.vmem [resolvable:$true] %s561_s20 }
  0xc7   : > { %s535_s28 = scalar_lea.sflag [#allocation14], %s1352_s27  ;;  %s1011_s6 = scalar_lea.vmem %s562_s20, 128 }
  0xc8   : > { %p1012_p7 = scmp.ne.s32.totalorder %s562_s20, %s1011_s6  ;;  %s1135_s29 = smov [#allocation13]  }
  0xc9   : > { %s1015_s8 = sshll.u32 %s1135_s29, 4  ;;  %s1016_s8 = int_to_ptr.vmem [resolvable:$false] %s1015_s8 }
  0xca   : > { %p1013_p0 = pnand %p1012_p7, %p1248_p1  ;;  %s1017_s0 = scalar_lea.vmem %s1016_s8, 256 }
  0xcb   : > { %p1018_p4 = scmp.lt.s32.totalorder %s562_s20, %s1016_s8  ;;  %p1019_p6 = scmp.lt.s32.totalorder %s1017_s0, %s1011_s6 }
  0xcc   : > { %p1014_p2 = pneg %p1013_p0 }
  0xcd   : > { %p1020_p5 = por %p1019_p6, %p1018_p4 }
  0xcf   : > { %p1021_p9 = pnand %p1020_p5, %p1014_p2 }
  0xd1   : > { %1024 = shalt.err (!%p1021_p9)
}
  0xd2   : > { %s1025_s24 = scalar_lea.hbm %s559_s12, 128  ;;  %s1029_s7 = scalar_lea.hbm %s1474_s5, 256 }
  0xd3   : > { %p1026_p10 = scmp.ne.s32.totalorder %s559_s12, %s1025_s24  ;;  %p1030_p12 = scmp.lt.s32.totalorder %s559_s12, %s1474_s5 }
  0xd4   : > { %p1031_p13 = scmp.lt.s32.totalorder %s1029_s7, %s1025_s24 }
  0xd5   : > { %p1027_p8 = pnand %p1026_p10, %p1248_p1 }
  0xd6   : > { %p1032_p7 = por %p1031_p13, %p1030_p12 }
  0xd7   : > { %p1028_p11 = pneg %p1027_p8 }
  0xd9   : > { %p1033_p0 = pnand %p1032_p7, %p1028_p11 }
  0xdb   : > { %1036 = shalt.err (!%p1033_p0)
}
  0xdc   : > { %775 = dma.vmem_to_hbm [thread:$0]  (%p1248_p1), %s562_s20, 128, %s559_s12, %s535_s28  }
  0xdd PF: > { %s573_s30 = sand.u32 1, %s1095_s18   ;;  %p1497_p2 = scmp.ge.s32.totalorder %s1127_s26, 2 }
  0xde   : > { %s574_s14 = scalar_lea.sflag [#allocation6], %s573_s30 }
  0xdf   : > { %p792_p4 = pnand %p1497_p2, %p1253_p3 }
  0xe1   : > { %p793_p6 = pneg %p792_p4 }
  0xe3   : > { %1086 = dma.done.wait (%p793_p6), %s574_s14, 128  }
  0xe4   : > { %1088 = vsyncadd (%p793_p6), %s574_s14, 4294967168  ;;  %s583_s10 = scalar_lea.sflag [#allocation14], %s573_s30 }
  0xe5   : > { %1090 = dma.done.wait (%p793_p6), %s583_s10, 128  }
  0xe6   : > { %1092 = vsyncadd (%p793_p6), %s583_s10, 4294967168  ;;  %s31_s26 = sadd.s32 1, %s1127_s26   ;;  %s1498_s15 = sld [smem:[#allocation20_spill]] }
  0xe7   : > { %p28_p5 = scmp.ge.s32.totalorder %s31_s26, 4   ;;  %s1499_s20 = sld [smem:[#allocation24_spill]] }
  0xe8   : > { %s1500_s11 = sld [smem:[#allocation21_spill]]  ;;  %s1504_s18 = smov %s1099_s19 }
  0xe9   : > { %s1501_s23 = sld [smem:[#allocation25_spill]]  ;;  %s1506_s21 = smov %s1111_s22 }
  0xea   : > { %s1502_s24 = sld [smem:[#allocation22_spill]]  ;;  %30 = sbr.rel (!%p28_p5) target bundleno = 17 (0x11), region = 159 }
  0xeb   : > { %s1503_s25 = sld [smem:[#allocation23_spill]] }
  0xec   : > { %s1505_s19 = smov %s1498_s15 }
  0xee   : > { %s1507_s22 = smov %s1500_s11 }
  0xef   :  { %588 = vsyncpa [#allocation5], 1 }
  0xf0   :  { %590 = vsyncpa [#allocation5 + $0x1], 1 }
  0xf1   :  { %591 = vsyncpa [#allocation8], 1 }
  0xf2   :  { %593 = vsyncpa [#allocation8 + $0x1], 1 }
  0xf3   :  { %594 = vsyncpa [#allocation11], 1 }
  0xf4   :  { %596 = vsyncpa [#allocation11 + $0x1], 1 }
  0xf5   :  { %597 = vsyncpa [#allocation6], 1 }
  0xf6   :  { %599 = vsyncpa [#allocation6 + $0x1], 1 }
  0xf7   :  { %600 = vsyncpa [#allocation14], 1 }
  0xf8   :  { %602 = vsyncpa [#allocation14 + $0x1], 1 }

</bundles_post_ra>
